<compile_context>
chip_gen: v6e
topology: v6e:2x2x1
jax: 0.10.0
libtpu: 0.0.40
codegen_flags: <defaults>
</compile_context>

<pallas_src>
import jax
import jax.numpy as jnp
from jax.experimental import pallas as pl
from jax.experimental.pallas import tpu as pltpu

HL = 3          # hidden layer size (hl = 3 in the PyTorch module)
IN_DIM = 3
OUT_DIM = 3

IN_PAD = 8      # padded input width  (K of matmul #1)
HID_PAD = 8     # padded hidden width (K of matmul #2)
LANE = 128      # lane width of the resident packed weights
SUBLANE = 8     # batch-tile rows kept a multiple of this
SMALL_MAX = 256 # grid-less path below this batch size

_MiB = 1024 * 1024
try:  # clamp the scoped-VMEM request to what the chip actually has
    _VMEM_CAP = int(pltpu.get_tpu_info().vmem_capacity_bytes)
except Exception:
    _VMEM_CAP = 128 * _MiB
_VMEM_LIMIT = min(56 * _MiB, (_VMEM_CAP * 3) // 4)
# Batch tile: big enough that the ~0.35us per-grid-step overhead is amortized;
# shrink if the chip's VMEM budget is unexpectedly small.
TB = 8192 if _VMEM_LIMIT >= 48 * _MiB else 2048


def _round_up(v, m):
    return ((v + m - 1) // m) * m


def _mlp_kernel(x_ref, ws_ref, bs_ref, o_ref):
    # x_ref:  (tb, IN_DIM)   raw input rows (no host-side padding)
    # ws_ref: (2, 8, LANE)   ws[0] = fc1 W.T padded, ws[1] = fc2 W.T padded
    # bs_ref: (2, LANE)      bs[0] = fc1 bias, bs[1] = fc2 bias (padded)
    # o_ref:  (tb, OUT_DIM)  valid output columns only (narrow HBM writeback)
    x = x_ref[...]
    tb = x.shape[0]
    # Pad K to 8 in-kernel (lane concat is cheap; padded lanes hit zero weights).
    x8 = jnp.concatenate(
        [x, jnp.zeros((tb, IN_PAD - IN_DIM), x.dtype)], axis=-1)
    w1 = ws_ref[0]
    w2 = ws_ref[1]
    b = bs_ref[...]
    # fc1 + tanh: (tb, 8) @ (8, 128). Hidden columns >= HL are tanh(0) = 0.
    h = jnp.tanh(jnp.dot(x8, w1, preferred_element_type=jnp.float32) + b[0:1, :])
    # fc2: only the first HID_PAD hidden columns can be nonzero -> K = 8.
    y = jnp.dot(h[:, :HID_PAD], w2, preferred_element_type=jnp.float32) + b[1:2, :]
    # Store only the valid 3 output columns -> ~42x less HBM writeback.
    o_ref[...] = y[:, :OUT_DIM].astype(o_ref.dtype)


def pack_params(w1, b1, w2, b2):
    """Pad + transpose PyTorch-layout params ONCE (outside the per-call path).

    w1: (HL, IN_DIM), b1: (HL,)       -- fc1
    w2: (OUT_DIM, HL), b2: (OUT_DIM,) -- fc2
    Returns ws (2, 8, 128) and bs (2, 128), zero-padded.
    """
    ws = jnp.zeros((2, IN_PAD, LANE), jnp.float32)
    ws = ws.at[0, :IN_DIM, :HL].set(w1.T.astype(jnp.float32))
    ws = ws.at[1, :HL, :OUT_DIM].set(w2.T.astype(jnp.float32))
    bs = jnp.zeros((2, LANE), jnp.float32)
    bs = bs.at[0, :HL].set(b1.astype(jnp.float32))
    bs = bs.at[1, :OUT_DIM].set(b2.astype(jnp.float32))
    return ws, bs


def _forward_impl(x, ws, bs):
    if x.dtype != jnp.float32:
        x = x.astype(jnp.float32)
    B = x.shape[0]

    if B <= SMALL_MAX:
        # Tiny batch: grid-less call, whole (B,3) arrays as full blocks.
        # (At this size everything is fixed launch overhead anyway.)
        return pl.pallas_call(
            _mlp_kernel,
            out_shape=jax.ShapeDtypeStruct((B, OUT_DIM), jnp.float32),
        )(x, ws, bs)

    # Gridded path: stream (tb, 3) row tiles, weights/biases stay resident via
    # constant index_maps. Use at least 2 tiles (feeds both TCs on v7x) and at
    # most TB rows per tile; ragged last tile is handled by Pallas masking.
    tb = min(TB, _round_up((B + 1) // 2, SUBLANE))
    grid = (B + tb - 1) // tb
    return pl.pallas_call(
        _mlp_kernel,
        out_shape=jax.ShapeDtypeStruct((B, OUT_DIM), jnp.float32),
        grid_spec=pltpu.PrefetchScalarGridSpec(
            num_scalar_prefetch=0,
            grid=(grid,),
            in_specs=[
                pl.BlockSpec((tb, IN_DIM), lambda i: (i, 0)),
                pl.BlockSpec((2, IN_PAD, LANE), lambda i: (0, 0, 0)),
                pl.BlockSpec((2, LANE), lambda i: (0, 0)),
            ],
            out_specs=pl.BlockSpec((tb, OUT_DIM), lambda i: (i, 0)),
        ),
        compiler_params=pltpu.CompilerParams(
            dimension_semantics=("parallel",),
            vmem_limit_bytes=_VMEM_LIMIT),
    )(x, ws, bs)


net_forward = jax.jit(_forward_impl)


def init_params(key):
    """Deterministic init mimicking nn.Linear's U(-1/sqrt(fan_in), 1/sqrt(fan_in))."""
    k1, k2, k3, k4 = jax.random.split(key, 4)
    bound1 = 1.0 / jnp.sqrt(jnp.float32(IN_DIM))
    bound2 = 1.0 / jnp.sqrt(jnp.float32(HL))
    w1 = jax.random.uniform(k1, (HL, IN_DIM), jnp.float32, -bound1, bound1)
    b1 = jax.random.uniform(k2, (HL,), jnp.float32, -bound1, bound1)
    w2 = jax.random.uniform(k3, (OUT_DIM, HL), jnp.float32, -bound2, bound2)
    b2 = jax.random.uniform(k4, (OUT_DIM,), jnp.float32, -bound2, bound2)
    return w1, b1, w2, b2


if __name__ == "__main__":
    key = jax.random.PRNGKey(0)
    kx, kx2, kx3, kp = jax.random.split(key, 4)

    w1, b1, w2, b2 = init_params(kp)
    ws, bs = pack_params(w1, b1, w2, b2)   # padded/packed once, reused per call

    def ref_fn(xv):
        return jnp.tanh(xv @ w1.T + b1) @ w2.T + b2

    # Small batch of iris-like samples -> grid-less path.
    B = 8
    x = jax.random.normal(kx, (B, IN_DIM), jnp.float32)
    out = jax.block_until_ready(net_forward(x, ws, bs))
    assert out.shape == (B, OUT_DIM)
    assert jnp.allclose(out, ref_fn(x), atol=1e-5, rtol=1e-5)

    # Mid-size batch -> gridded path, 2 tiles (ragged last tile), "parallel".
    B2 = 2500
    x2 = jax.random.normal(kx2, (B2, IN_DIM), jnp.float32)
    out2 = jax.block_until_ready(net_forward(x2, ws, bs))
    assert out2.shape == (B2, OUT_DIM)
    assert jnp.allclose(out2, ref_fn(x2), atol=1e-5, rtol=1e-5)

    # Large batch -> full TB-row tiles + ragged tail, weights resident.
    B3 = 20000
    x3 = jax.random.normal(kx3, (B3, IN_DIM), jnp.float32)
    out3 = jax.block_until_ready(net_forward(x3, ws, bs))
    assert out3.shape == (B3, OUT_DIM)
    assert jnp.allclose(out3, ref_fn(x3), atol=1e-5, rtol=1e-5)

    # TODO(synk): the PyTorch module's side effect of writing the global
    # `xtrained` has no kernel-side equivalent; the output is simply returned.
    print("KERNEL_OK")
</pallas_src>

<mosaic_0001>
module attributes {stable_mosaic.version = 11 : i64} {
  func.func @_mlp_kernel(%arg0: memref<8x3xf32, #tpu.memory_space<vmem>>, %arg1: memref<2x8x128xf32, #tpu.memory_space<vmem>>, %arg2: memref<2x128xf32, #tpu.memory_space<vmem>>, %arg3: memref<8x3xf32, #tpu.memory_space<vmem>>) attributes {dimension_semantics = [], scalar_prefetch = 0 : i64, scratch_operands = 0 : i64, tpu.core_type = #tpu.core_type<tc>} {
    %c0 = arith.constant 0 : index
    %c0_0 = arith.constant 0 : index
    %0 = vector.load %arg0[%c0, %c0_0] : memref<8x3xf32, #tpu.memory_space<vmem>>, vector<8x3xf32>
    %cst = arith.constant 0.000000e+00 : f32
    %1 = vector.broadcast %cst : f32 to vector<8x5xf32>
    %2 = tpu.concatenate %0, %1 in 1 : vector<8x3xf32>, vector<8x5xf32> -> vector<8x8xf32>
    %c0_1 = arith.constant 0 : index
    %c0_2 = arith.constant 0 : index
    %c0_3 = arith.constant 0 : index
    %3 = vector.load %arg1[%c0_1, %c0_2, %c0_3] : memref<2x8x128xf32, #tpu.memory_space<vmem>>, vector<1x8x128xf32>
    %4 = vector.shape_cast %3 : vector<1x8x128xf32> to vector<8x128xf32>
    %c1 = arith.constant 1 : index
    %c0_4 = arith.constant 0 : index
    %c0_5 = arith.constant 0 : index
    %5 = vector.load %arg1[%c1, %c0_4, %c0_5] : memref<2x8x128xf32, #tpu.memory_space<vmem>>, vector<1x8x128xf32>
    %6 = vector.shape_cast %5 : vector<1x8x128xf32> to vector<8x128xf32>
    %c0_6 = arith.constant 0 : index
    %c0_7 = arith.constant 0 : index
    %7 = vector.load %arg2[%c0_6, %c0_7] : memref<2x128xf32, #tpu.memory_space<vmem>>, vector<2x128xf32>
    %cst_8 = arith.constant dense<0.000000e+00> : vector<8x128xf32>
    %8 = tpu.matmul %2, %4, %cst_8 {dimension_numbers = #tpu.dot_dimension_numbers<[1], [0], [0], [1], [0, 0, 1, 1], [], []>} : vector<8x8xf32>, vector<8x128xf32>, vector<8x128xf32> -> vector<8x128xf32>
    %9 = vector.extract_strided_slice %7 {offsets = [0, 0], sizes = [1, 128], strides = [1, 1]} : vector<2x128xf32> to vector<1x128xf32>
    %10 = vector.broadcast %9 : vector<1x128xf32> to vector<8x128xf32>
    %11 = arith.addf %8, %10 : vector<8x128xf32>
    %12 = math.tanh %11 : vector<8x128xf32>
    %13 = vector.extract_strided_slice %12 {offsets = [0, 0], sizes = [8, 8], strides = [1, 1]} : vector<8x128xf32> to vector<8x8xf32>
    %cst_9 = arith.constant dense<0.000000e+00> : vector<8x128xf32>
    %14 = tpu.matmul %13, %6, %cst_9 {dimension_numbers = #tpu.dot_dimension_numbers<[1], [0], [0], [1], [0, 0, 1, 1], [], []>} : vector<8x8xf32>, vector<8x128xf32>, vector<8x128xf32> -> vector<8x128xf32>
    %15 = vector.extract_strided_slice %7 {offsets = [1, 0], sizes = [1, 128], strides = [1, 1]} : vector<2x128xf32> to vector<1x128xf32>
    %16 = vector.broadcast %15 : vector<1x128xf32> to vector<8x128xf32>
    %17 = arith.addf %14, %16 : vector<8x128xf32>
    %18 = vector.extract_strided_slice %17 {offsets = [0, 0], sizes = [8, 3], strides = [1, 1]} : vector<8x128xf32> to vector<8x3xf32>
    %c0_10 = arith.constant 0 : index
    %c0_11 = arith.constant 0 : index
    %19 = vector.load %arg3[%c0_10, %c0_11] : memref<8x3xf32, #tpu.memory_space<vmem>>, vector<8x3xf32>
    tpu.vector_store %arg3[%c0_10, %c0_11], %18 {strides = array<i32>} : memref<8x3xf32, #tpu.memory_space<vmem>>, vector<8x3xf32>,
    return
  }
}

</mosaic_0001>

<bundles_post_ra>
// kernel: _forward_impl.1
= control target key start
LH: loop header
LB: loop body
LE: loop exit
PB: predicated region body
PF: predicated region fallthrough
CT: control target
= control target key end

     0   :  { %8 = vsyncpa [#allocation3], 0  ;;  %s242_s12 = smov [#allocation2]   ;;  %s283_s0 = inlined_call_operand.vmem [shape: f32[8,3], index: 0, kind: input, shape index: {}]   ;;  %s284_s1 = inlined_call_operand.hbm [shape: f32[2,8,128], index: 1, kind: input, shape index: {}]   ;;  %s285_s2 = inlined_call_operand.vmem [shape: f32[2,128], index: 2, kind: input, shape index: {}]   ;;  %s286_s3 = inlined_call_operand.vmem [shape: f32[8,3], index: 3, kind: output, shape index: {}]  }
   0x1   :  { %s16_s13 = sshll.u32 %s242_s12, 4  ;;  %s17_s13 = int_to_ptr.vmem [resolvable:$true] %s16_s13 }
   0x2   :  { %s228_s14 = scalar_lea.vmem %s17_s13, 256  ;;  %p233_p1 = scmp.lt.s32.totalorder %s17_s13, %s17_s13 }
   0x3   :  { %p229_p0 = scmp.ne.s32.totalorder %s17_s13, %s228_s14  ;;  %p234_p2 = scmp.lt.s32.totalorder %s228_s14, %s228_s14 }
   0x5   :  { %p235_p3 = por %p234_p2, %p233_p1 }
   0x7   :  { %p236_p4 = pnand %p235_p3, %p229_p0 }
   0x9   :  { %239 = shalt.err (!%p236_p4)
}
   0xa   :  { %s243_s15 = smov 128   ;;  %s244_s16 = smov 8  }
   0xb   :  { %22 = dma.hbm_to_vmem [thread:$0]  %s284_s1, 256, %s17_s13, [#allocation3], %s243_s15, %s243_s15, %s244_s16  }
   0xc   :  { %240 = dma.done.wait [#allocation3], 256  }
   0xd   :  { %241 = vsyncadd [#allocation3], 4294967040  ;;  %v245_v0 = vmov 0.0   ;;  %vm246_vm0 = vmmov 0   ;;  %vm29_vm1 = vcmask 23552   ;;  %vm39_vm2 = vcmask 64512  }
   0xe   :  { %203 = vmatprep.subr.mxu0 %v245_v0  ;;  %205 = vmatprep.mubr.msk.f32.mxu0 %vm246_vm0, %v245_v0  ;;  %v31_v1 = vld [vmem:[#allocation2] sm:$0xff]  ;;  %v33_v4 = vld [vmem:[#allocation2 + $0x8] sm:$0xff]  ;;  %v35_v5 = vlaneseq }
   0xf   :  { %208 = vmatprep.subr.mxu1 %v245_v0  ;;  %210 = vmatprep.mubr.msk.f32.mxu1 %vm246_vm0, %v245_v0  ;;  %v28_v2 = vld [vmem:[%s283_s0] sm:$0xff] }
  0x10   :  { %204 = vmatpush3.msra.mxu0 %v31_v1  ;;  %v30_v3 = vsel %vm29_vm1, %v28_v2, 0.0  ;;  %209 = vmatpush3.msra.mxu1 %v33_v4  ;;  %v36_v6 = vshrl.u32 %v35_v5, 7  ;;  %v34_v8 = vld [vmem:[%s285_s2] sm:$0x3] }
  0x11   :  { %206 = vmatmul.mubr.msk.f32.vlgmr.msra.gmra.mxu0 %vm39_vm2, %v30_v3 }
  0x12   :  { %v37_v7 = vsub.s32 0, %v36_v6  ;;  %v116_v14 = vsub.s32 1, %v36_v6 }
  0x14   :  { %v38_v9 = vrot.slane %v34_v8, %v37_v7  ;;  %v117_v15 = vrot.slane %v34_v8, %v116_v14 }
  0xd1   :  { %v109_v10 = vpop.f32.mrf.mxu0 }
  0xd2   :  { %v110_v11 = vadd.f32 %v109_v10, %v38_v9 }
  0xd3   :  { %v207_v12 = vpop.f32.mrf.mxu0 }
  0xd4   :  { %218 = vtanh.f32 %v110_v11 }
  0xe1   :  { %v219_v13 = vpop.eup %218 }
  0xe2   :  { %211 = vmatmul.mubr.msk.f32.vlgmr.msra.gmra.mxu1 %vm39_vm2, %v219_v13 }
 0x1a2   :  { %v187_v16 = vpop.f32.mrf.mxu1 }
 0x1a3   :  { %v188_v17 = vadd.f32 %v187_v16, %v117_v15 }
 0x1a4   :  { %v212_v18 = vpop.f32.mrf.mxu1 }
 0x1a5   :  { %191 = vst.msk [vmem:[%s286_s3] sm:$0xff] %vm29_vm1, %v188_v17 }
 0x1a6   :  { %196 = vsyncpa [#allocation3], 1 }

</bundles_post_ra>
